<compile_context>
chip_gen: v7x
topology: tpu7x:2x2x1
jax: 0.10.0
libtpu: 0.0.40
codegen_flags: <defaults>
</compile_context>

<pallas_src>
import itertools

import numpy as np
import jax
import jax.numpy as jnp
from jax.experimental import pallas as pl
from jax.experimental.pallas import tpu as pltpu


# ----------------------------------------------------------------------------
# Pallas kernel: fuzzify -> rules -> L1-normalize -> consequent -> weighted sum
# ----------------------------------------------------------------------------
def anfis_kernel(xa_ref, xr_ref, c_ref, w_ref, sel_ref, ct_ref, out_ref):
    # xa_ref  : (TB, n_in+1)       x with a trailing ones column (consequent input)
    # xr_ref  : (TB, n_in*n_mfs)   x repeated n_mfs times per variable
    # c_ref   : (1,  n_in*n_mfs)   gaussian MF centers, flattened
    # w_ref   : (1,  n_in*n_mfs)   0.5 / sigma^2, flattened
    # sel_ref : (n_in*n_mfs, R)    one-hot rule selection (== torch.gather)
    # ct_ref  : (n_in+1, n_out*R)  consequent coeffs, ct[j, o*R+r] = coeffs[r, o, j]
    # out_ref : (TB, n_out)
    n_rules = sel_ref.shape[1]
    n_out = out_ref.shape[1]

    xa = xa_ref[...]
    xr = xr_ref[...]

    # FuzzyLayer + RulesLayer fused in log space: one VPU slab of log-memberships,
    # then ONE matmul that both selects the per-rule MFs (one-hot == gather) and
    # sums their logs; a single exp recovers prod_v mf_v(x).
    d = xr - c_ref[...]
    logmf = -(d * d) * w_ref[...]                                        # (TB, VM)
    log_rules = jnp.dot(logmf, sel_ref[...],
                        preferred_element_type=jnp.float32)              # (TB, R)
    rules = jnp.exp(log_rules)                                           # (TB, R) >= 0

    # F.normalize(p=1, dim=1): rules are products of gaussians -> nonnegative,
    # so the abs is dropped.  EUP reciprocal instead of a VALU divide; approx=True
    # would be cheaper still but its guaranteed accuracy is below the strict
    # 1e-4/1e-5 f32 check used in this script.
    denom = jnp.maximum(jnp.sum(rules, axis=1, keepdims=True), 1e-12)
    weights = rules * pl.reciprocal(denom, approx=False)                 # (TB, R)

    # ConsequentLayer + bmm fused: one matmul producing all n_out blocks of R
    # rule outputs, then a per-output multiply-and-reduce (static unroll, n_out tiny).
    tsk = jnp.dot(xa, ct_ref[...], preferred_element_type=jnp.float32)   # (TB, n_out*R)
    preds = [
        jnp.sum(tsk[:, o * n_rules:(o + 1) * n_rules] * weights,
                axis=1, keepdims=True)
        for o in range(n_out)
    ]
    # Single dense store per tile (no width-1 masked column stores).
    out_ref[...] = jnp.concatenate(preds, axis=1)


# ----------------------------------------------------------------------------
# Wrapper: parameter re-layout (glue) + pallas_call
# ----------------------------------------------------------------------------
def anfis_forward(x, centers, sigmas, mf_idx, coeffs, *, block_b=None):
    B, n_in = x.shape
    n_rules, n_out, n_inp1 = coeffs.shape
    n_mfs = centers.shape[1]
    assert n_inp1 == n_in + 1

    # Big batch tiles amortize the ~0.35us/grid-step overhead; for large B the
    # grid keeps >= 2 steps so the "parallel" batch axis can shard across v7x's
    # two TensorCores (no-op on v5e/v6e).
    if block_b is None:
        block_b = B if B <= 512 else 512
    grid_b = pl.cdiv(B, block_b)
    b_pad = grid_b * block_b
    if b_pad != B:  # ragged batch: pad with zero rows, slice the output back
        x = jnp.concatenate([x, jnp.zeros((b_pad - B, n_in), x.dtype)], axis=0)

    vm = n_in * n_mfs
    xa = jnp.concatenate([x, jnp.ones((b_pad, 1), x.dtype)], axis=1)      # (Bp, n_in+1)
    xr = jnp.repeat(x, n_mfs, axis=1)                                     # (Bp, VM)
    c_flat = centers.reshape(1, vm).astype(jnp.float32)                   # (1, VM)
    w_flat = (0.5 / (sigmas ** 2)).reshape(1, vm).astype(jnp.float32)     # (1, VM)
    onehot = jax.nn.one_hot(mf_idx, n_mfs, dtype=jnp.float32)             # (R, n_in, M)
    sel_flat = jnp.transpose(onehot, (1, 2, 0)).reshape(vm, n_rules)      # (VM, R)
    ct2 = jnp.transpose(coeffs, (2, 1, 0)).reshape(n_in + 1, n_out * n_rules)

    # NOTE: the parameter operands have constant index_maps; for large rule
    # tables (R = n_mfs**n_in) single-buffer them (pipeline_mode=pl.Buffered(1))
    # and/or cast sel_flat to bf16 (one-hot is lossless) to stay inside v7x's
    # 64 MiB VMEM.  Irrelevant at this demo size, so kept default here.
    out = pl.pallas_call(
        anfis_kernel,
        out_shape=jax.ShapeDtypeStruct((b_pad, n_out), jnp.float32),
        grid=(grid_b,),
        in_specs=[
            pl.BlockSpec((block_b, n_in + 1), lambda i: (i, 0)),
            pl.BlockSpec((block_b, vm), lambda i: (i, 0)),
            pl.BlockSpec((1, vm), lambda i: (0, 0)),
            pl.BlockSpec((1, vm), lambda i: (0, 0)),
            pl.BlockSpec((vm, n_rules), lambda i: (0, 0)),
            pl.BlockSpec((n_in + 1, n_out * n_rules), lambda i: (0, 0)),
        ],
        out_specs=pl.BlockSpec((block_b, n_out), lambda i: (i, 0)),
        compiler_params=pltpu.CompilerParams(dimension_semantics=("parallel",)),
    )(xa, xr, c_flat, w_flat, sel_flat, ct2)
    return out[:B]


# ----------------------------------------------------------------------------
# Pure-JAX reference (mirrors the PyTorch forward exactly)
# ----------------------------------------------------------------------------
def anfis_reference(x, centers, sigmas, mf_idx, coeffs):
    B, n_in = x.shape
    n_rules = mf_idx.shape[0]
    fuzz = jnp.exp(-((x[:, :, None] - centers[None, :, :]) ** 2)
                   / (2.0 * sigmas[None, :, :] ** 2))                # (B, V, M)
    v_grid = jnp.broadcast_to(jnp.arange(n_in)[None, :], (n_rules, n_in))
    ant = fuzz[:, v_grid, mf_idx]                                    # (B, R, V)  (== torch.gather)
    rules = jnp.prod(ant, axis=2)                                    # (B, R)
    weights = rules / jnp.maximum(
        jnp.sum(jnp.abs(rules), axis=1, keepdims=True), 1e-12)
    x_new = jnp.concatenate([x, jnp.ones((B, 1), x.dtype)], axis=1)  # (B, J)
    rule_tsk = jnp.einsum('roj,bj->bor', coeffs, x_new)              # (B, O, R)
    preds = jnp.einsum('bor,br->bo', rule_tsk, weights)              # (B, O)
    return preds


if __name__ == "__main__":
    # Small ANFIS config: 4 input vars, 2 gaussian MFs each -> 16 rules, 3 outputs.
    B, n_in, n_mfs, n_out = 16, 4, 2, 3
    n_rules = n_mfs ** n_in

    key = jax.random.PRNGKey(0)
    kx, kc = jax.random.split(key)
    x = jax.random.normal(kx, (B, n_in), dtype=jnp.float32)

    # Deterministic gaussian MF parameters (centers spread over [-1, 1], unit sigma).
    centers = jnp.tile(jnp.linspace(-1.0, 1.0, n_mfs, dtype=jnp.float32)[None, :],
                       (n_in, 1))                                    # (n_in, n_mfs)
    sigmas = jnp.full((n_in, n_mfs), 1.0, dtype=jnp.float32)

    # RulesLayer index table: cartesian product of MF indices (compile-time constant).
    mf_idx = jnp.asarray(
        list(itertools.product(*[range(n_mfs)] * n_in)), dtype=jnp.int32)  # (R, n_in)

    # ConsequentLayer coeffs: module __init__ uses zeros (pre-training); initialize
    # deterministically nonzero here so the consequent matmul is exercised.
    coeffs = 0.1 * jax.random.normal(kc, (n_rules, n_out, n_in + 1), dtype=jnp.float32)

    out = anfis_forward(x, centers, sigmas, mf_idx, coeffs)   # block_b=B -> grid=(1,)
    out = jax.block_until_ready(out)

    ref = anfis_reference(x, centers, sigmas, mf_idx, coeffs)
    np.testing.assert_allclose(np.asarray(out), np.asarray(ref), rtol=1e-4, atol=1e-5)

    print("KERNEL_OK")
</pallas_src>

<mosaic_0001>
module attributes {stable_mosaic.version = 11 : i64} {
  func.func @anfis_kernel(%arg0: i32, %arg1: memref<16x5xf32, #tpu.memory_space<vmem>>, %arg2: memref<16x8xf32, #tpu.memory_space<vmem>>, %arg3: memref<1x8xf32, #tpu.memory_space<vmem>>, %arg4: memref<1x8xf32, #tpu.memory_space<vmem>>, %arg5: memref<8x16xf32, #tpu.memory_space<vmem>>, %arg6: memref<5x48xf32, #tpu.memory_space<vmem>>, %arg7: memref<16x3xf32, #tpu.memory_space<vmem>>) attributes {dimension_semantics = [#tpu.dimension_semantics<parallel>], iteration_bounds = array<i64: 1>, scalar_prefetch = 0 : i64, scratch_operands = 0 : i64, tpu.core_type = #tpu.core_type<tc>, window_params = [{transform_indices = @transform_0, window_bounds = array<i64: 16, 5>}, {transform_indices = @transform_1, window_bounds = array<i64: 16, 8>}, {pipeline_mode = #tpu.pipeline_mode<synchronous>, transform_indices = @transform_2, window_bounds = array<i64: 1, 8>}, {pipeline_mode = #tpu.pipeline_mode<synchronous>, transform_indices = @transform_3, window_bounds = array<i64: 1, 8>}, {pipeline_mode = #tpu.pipeline_mode<synchronous>, transform_indices = @transform_4, window_bounds = array<i64: 8, 16>}, {pipeline_mode = #tpu.pipeline_mode<synchronous>, transform_indices = @transform_5, window_bounds = array<i64: 5, 48>}, {transform_indices = @transform_6, window_bounds = array<i64: 16, 3>}]} {
    %c0 = arith.constant 0 : index
    %c0_0 = arith.constant 0 : index
    %0 = vector.load %arg1[%c0, %c0_0] : memref<16x5xf32, #tpu.memory_space<vmem>>, vector<16x5xf32>
    %c0_1 = arith.constant 0 : index
    %c0_2 = arith.constant 0 : index
    %1 = vector.load %arg2[%c0_1, %c0_2] : memref<16x8xf32, #tpu.memory_space<vmem>>, vector<16x8xf32>
    %c0_3 = arith.constant 0 : index
    %c0_4 = arith.constant 0 : index
    %2 = vector.load %arg3[%c0_3, %c0_4] : memref<1x8xf32, #tpu.memory_space<vmem>>, vector<1x8xf32>
    %3 = vector.broadcast %2 : vector<1x8xf32> to vector<16x8xf32>
    %4 = arith.subf %1, %3 : vector<16x8xf32>
    %5 = arith.mulf %4, %4 : vector<16x8xf32>
    %cst = arith.constant 0.000000e+00 : f32
    %6 = vector.broadcast %cst : f32 to vector<16x8xf32>
    %7 = arith.subf %6, %5 : vector<16x8xf32>
    %c0_5 = arith.constant 0 : index
    %c0_6 = arith.constant 0 : index
    %8 = vector.load %arg4[%c0_5, %c0_6] : memref<1x8xf32, #tpu.memory_space<vmem>>, vector<1x8xf32>
    %9 = vector.broadcast %8 : vector<1x8xf32> to vector<16x8xf32>
    %10 = arith.mulf %7, %9 : vector<16x8xf32>
    %c0_7 = arith.constant 0 : index
    %c0_8 = arith.constant 0 : index
    %11 = vector.load %arg5[%c0_7, %c0_8] : memref<8x16xf32, #tpu.memory_space<vmem>>, vector<8x16xf32>
    %cst_9 = arith.constant dense<0.000000e+00> : vector<16x16xf32>
    %12 = tpu.matmul %10, %11, %cst_9 {dimension_numbers = #tpu.dot_dimension_numbers<[1], [0], [0], [1], [0, 0, 1, 1], [], []>} : vector<16x8xf32>, vector<8x16xf32>, vector<16x16xf32> -> vector<16x16xf32>
    %13 = math.exp %12 : vector<16x16xf32>
    %cst_10 = arith.constant dense<0.000000e+00> : vector<16xf32>
    %14 = vector.multi_reduction <add>, %13, %cst_10 [1] : vector<16x16xf32> to vector<16xf32>
    %15 = vector.shape_cast %14 : vector<16xf32> to vector<16x1xf32>
    %cst_11 = arith.constant 9.99999996E-13 : f32
    %16 = vector.broadcast %cst_11 : f32 to vector<16x1xf32>
    %17 = arith.maximumf %15, %16 : vector<16x1xf32>
    %18 = tpu.reciprocal %17 : vector<16x1xf32> -> vector<16x1xf32>
    %19 = vector.broadcast %18 : vector<16x1xf32> to vector<16x16xf32>
    %20 = arith.mulf %13, %19 : vector<16x16xf32>
    %c0_12 = arith.constant 0 : index
    %c0_13 = arith.constant 0 : index
    %21 = vector.load %arg6[%c0_12, %c0_13] : memref<5x48xf32, #tpu.memory_space<vmem>>, vector<5x48xf32>
    %cst_14 = arith.constant dense<0.000000e+00> : vector<16x48xf32>
    %22 = tpu.matmul %0, %21, %cst_14 {dimension_numbers = #tpu.dot_dimension_numbers<[1], [0], [0], [1], [0, 0, 1, 1], [], []>} : vector<16x5xf32>, vector<5x48xf32>, vector<16x48xf32> -> vector<16x48xf32>
    %23 = vector.extract_strided_slice %22 {offsets = [0, 0], sizes = [16, 16], strides = [1, 1]} : vector<16x48xf32> to vector<16x16xf32>
    %24 = arith.mulf %23, %20 : vector<16x16xf32>
    %cst_15 = arith.constant dense<0.000000e+00> : vector<16xf32>
    %25 = vector.multi_reduction <add>, %24, %cst_15 [1] : vector<16x16xf32> to vector<16xf32>
    %26 = vector.shape_cast %25 : vector<16xf32> to vector<16x1xf32>
    %27 = vector.extract_strided_slice %22 {offsets = [0, 16], sizes = [16, 16], strides = [1, 1]} : vector<16x48xf32> to vector<16x16xf32>
    %28 = arith.mulf %27, %20 : vector<16x16xf32>
    %cst_16 = arith.constant dense<0.000000e+00> : vector<16xf32>
    %29 = vector.multi_reduction <add>, %28, %cst_16 [1] : vector<16x16xf32> to vector<16xf32>
    %30 = vector.shape_cast %29 : vector<16xf32> to vector<16x1xf32>
    %31 = vector.extract_strided_slice %22 {offsets = [0, 32], sizes = [16, 16], strides = [1, 1]} : vector<16x48xf32> to vector<16x16xf32>
    %32 = arith.mulf %31, %20 : vector<16x16xf32>
    %cst_17 = arith.constant dense<0.000000e+00> : vector<16xf32>
    %33 = vector.multi_reduction <add>, %32, %cst_17 [1] : vector<16x16xf32> to vector<16xf32>
    %34 = vector.shape_cast %33 : vector<16xf32> to vector<16x1xf32>
    %35 = tpu.concatenate %26, %30, %34 in 1 : vector<16x1xf32>, vector<16x1xf32>, vector<16x1xf32> -> vector<16x3xf32>
    %c0_18 = arith.constant 0 : index
    %c0_19 = arith.constant 0 : index
    %36 = vector.load %arg7[%c0_18, %c0_19] : memref<16x3xf32, #tpu.memory_space<vmem>>, vector<16x3xf32>
    tpu.vector_store %arg7[%c0_18, %c0_19], %35 {strides = array<i32>} : memref<16x3xf32, #tpu.memory_space<vmem>>, vector<16x3xf32>,
    return
  }
  func.func @transform_0(%arg0: i32) -> (i32, i32) {
    %c0_i32 = arith.constant 0 : i32
    %c0_i32_0 = arith.constant 0 : i32
    return %arg0, %c0_i32 : i32, i32
  }
  func.func @transform_1(%arg0: i32) -> (i32, i32) {
    %c0_i32 = arith.constant 0 : i32
    %c0_i32_0 = arith.constant 0 : i32
    return %arg0, %c0_i32 : i32, i32
  }
  func.func @transform_2(%arg0: i32) -> (i32, i32) {
    %c0_i32 = arith.constant 0 : i32
    %c0_i32_0 = arith.constant 0 : i32
    %c0_i32_1 = arith.constant 0 : i32
    return %c0_i32, %c0_i32_0 : i32, i32
  }
  func.func @transform_3(%arg0: i32) -> (i32, i32) {
    %c0_i32 = arith.constant 0 : i32
    %c0_i32_0 = arith.constant 0 : i32
    %c0_i32_1 = arith.constant 0 : i32
    return %c0_i32, %c0_i32_0 : i32, i32
  }
  func.func @transform_4(%arg0: i32) -> (i32, i32) {
    %c0_i32 = arith.constant 0 : i32
    %c0_i32_0 = arith.constant 0 : i32
    %c0_i32_1 = arith.constant 0 : i32
    return %c0_i32, %c0_i32_0 : i32, i32
  }
  func.func @transform_5(%arg0: i32) -> (i32, i32) {
    %c0_i32 = arith.constant 0 : i32
    %c0_i32_0 = arith.constant 0 : i32
    %c0_i32_1 = arith.constant 0 : i32
    return %c0_i32, %c0_i32_0 : i32, i32
  }
  func.func @transform_6(%arg0: i32) -> (i32, i32) {
    %c0_i32 = arith.constant 0 : i32
    %c0_i32_0 = arith.constant 0 : i32
    return %arg0, %c0_i32 : i32, i32
  }
}

</mosaic_0001>

<bundles_post_ra>
// kernel: tpu_custom_call.1
= control target key start
LH: loop header
LB: loop body
LE: loop exit
PB: predicated region body
PF: predicated region fallthrough
CT: control target
= control target key end

     0   :  { %vm157_vm0 = vcmask 1044480   ;;  %vm150_vm1 = vcmask 39936   ;;  %vm50_vm2 = vcmask 64512   ;;  %vm136_vm3 = vcmask 130048   ;;  %s340_s9 = smov 112   ;;  %s341_s10 = smov 96   ;;  %s417_s4 = inlined_call_operand.vmem [shape: f32[8,16], index: 4, kind: input, shape index: {}]   ;;  %s418_s1 = inlined_call_operand.vmem [shape: f32[16,8], index: 1, kind: input, shape index: {}]   ;;  %s419_s2 = inlined_call_operand.vmem [shape: f32[1,8], index: 2, kind: input, shape index: {}]   ;;  %s420_s5 = inlined_call_operand.vmem [shape: f32[5,48], index: 5, kind: input, shape index: {}]   ;;  %s421_s0 = inlined_call_operand.vmem [shape: f32[16,5], index: 0, kind: input, shape index: {}]   ;;  %s422_s3 = inlined_call_operand.vmem [shape: f32[1,8], index: 3, kind: input, shape index: {}]   ;;  %s423_s6 = inlined_call_operand.vmem [shape: f32[16,3], index: 6, kind: output, shape index: {}]  }
   0x1   :  { %v49_v0 = vld [vmem:[%s417_s4] sm:$0xff]  ;;  %v26_v2 = vld [vmem:[%s418_s1 + $0x8] sm:$0xff]  ;;  %vm293_vm4 = vcmask 15360   ;;  %vm290_vm5 = vcmask 7168   ;;  %vm296_vm6 = vcmask 23552  }
   0x2   :  { %v25_v1 = vld [vmem:[%s418_s1] sm:$0xff]  ;;  %316 = vmatprep.subr.mxu0 %v49_v0  ;;  %v24_v8 = vld [vmem:[%s421_s0 + $0x8] sm:$0xff] }
   0x3   :  { %v303_v3 = vld [vmem:[%s419_s2] ss:$0 sm:$0xff]  ;;  %317 = vmatpush3.msra.mxu0 %v49_v0 }
   0x4   :  { %v149_v4 = vld [vmem:[%s420_s5] sm:$0x1f]  ;;  %v34_v5 = vsub.f32 %v25_v1, %v303_v3  ;;  %v35_v6 = vsub.f32 %v26_v2, %v303_v3 }
   0x5   :  { %321 = vmatprep.subr.msk.mxu1 %vm157_vm0, %v149_v4  ;;  %v23_v7 = vld [vmem:[%s421_s0] sm:$0xff]  ;;  %s338_s0 = smov 32  }
   0x6   :  { %322 = vmatpush3.msk.msra.mxu1 %vm157_vm0, %v149_v4  ;;  %323 = vmatprep.mubr.msk.f32.mxu1 %vm150_vm1, %v23_v7  ;;  %v36_v9 = vmul.f32 %v34_v5, %v34_v5  ;;  %v37_v10 = vmul.f32 %v35_v6, %v35_v6  ;;  %v304_v11 = vld [vmem:[%s422_s3] ss:$0 sm:$0xff]  ;;  %s339_s3 = smov 16  }
   0x7   :  { %324 = vmatmul.mubr.msk.f32.vlgmr.msra.gmra.mrb[0].mxu1 %vm150_vm1, %v24_v8 }
   0x8   :  { %v38_v12 = vsub.f32 0.0, %v36_v9  ;;  %v39_v13 = vsub.f32 0.0, %v37_v10 }
   0xa   :  { %v47_v14 = vmul.f32 %v304_v11, %v38_v12  ;;  %v48_v15 = vmul.f32 %v304_v11, %v39_v13 }
   0xc   :  { %318 = vmatprep.mubr.msk.f32.mxu0 %vm50_vm2, %v47_v14 }
   0xd   :  { %319 = vmatmul.mubr.msk.f32.vlgmr.msra.gmra.mrb[0].mxu0 %vm50_vm2, %v48_v15 }
  0xda   :  { %v325_v24 = vpop.f32.mrb[0].mxu1 }
  0xdb   :  { %v227_v25 = vpop.f32.mrb[1].mxu1 }
  0xe0   :  { %v320_v16 = vpop.f32.mrb[0].mxu0 }
  0xe1   :  { %v123_v17 = vpop.f32.mrb[1].mxu0  ;;  %v134_v18 = vmul.f32 1.442695, %v320_v16 }
  0xe2   :  { %v132_v19 = vmul.f32 1.442695, %v123_v17 }
  0xe4   :  { %330 = vpow2.f32 %v132_v19 }
  0xe5   :  { %332 = vpow2.f32 %v134_v18 }
  0xee   :  { %v331_v20 = vpop.eup %330 }
  0xef   :  { %v137_v21 = vsel %vm136_vm3, %v331_v20, 0.0  ;;  %v333_v22 = vpop.eup %332 }
  0xf0   :  { %138 = vadd.xlane.f32.xlu0 %v137_v21  ;;  %v140_v23 = vsel %vm136_vm3, %v333_v22, 0.0 }
  0xf4   :  { %141 = vadd.xlane.f32.xlu0 %v140_v23 }
 0x17d   :  { %v139_v26 = vpop.xlane.xlu0 %138 }
 0x17e   :  { %v143_v27 = vmax.f32 %v139_v26, 1e-12 }
 0x180   :  { %334 = vrcp.f32 %v143_v27 }
 0x181   :  { %v142_v28 = vpop.xlane.xlu0 %141 }
 0x182   :  { %v144_v29 = vmax.f32 %v142_v28, 1e-12 }
 0x184   :  { %336 = vrcp.f32 %v144_v29 }
 0x18a   :  { %v335_v30 = vpop.eup %334 }
 0x18b   :  { %v147_v31 = vmul.f32 %v335_v30, %v331_v20 }
 0x18d   :  { %v236_v32 = vmul.f32 %v227_v25, %v147_v31  ;;  %268 = vrot.lane.b32.xlu0 %v147_v31, %s338_s0 }
 0x18e   :  { %v337_v33 = vpop.eup %336 }
 0x18f   :  { %v148_v34 = vmul.f32 %v337_v33, %v333_v22  ;;  %v238_v45 = vsel %vm136_vm3, %v236_v32, 0.0 }
 0x191   :  { %248 = vrot.lane.b32.xlu1 %v148_v34, %s339_s3  ;;  %v237_v35 = vmul.f32 %v325_v24, %v148_v34 }
 0x193   :  { %v241_v36 = vsel %vm136_vm3, %v237_v35, 0.0 }
 0x195   :  { %246 = vrot.lane.b32.xlu1 %v147_v31, %s339_s3 }
 0x199   :  { %270 = vrot.lane.b32.xlu1 %v148_v34, %s338_s0 }
 0x1ac   :  { %242 = vadd.xlane.f32.xlu0 %v241_v36 }
 0x1ff   :  { %v269_v41 = vpop.permute.xlu0 %268 }
 0x200   :  { %v274_v42 = vmul.f32 %v269_v41, %v227_v25 }
 0x203   :  { %v249_v37 = vpop.permute.xlu1 %248 }
 0x204   :  { %v253_v38 = vmul.f32 %v325_v24, %v249_v37 }
 0x206   :  { %258 = vrot.lane.b32.xlu1 %v253_v38, %s340_s9 }
 0x207   :  { %v247_v39 = vpop.permute.xlu1 %246 }
 0x208   :  { %v252_v40 = vmul.f32 %v247_v39, %v227_v25 }
 0x20a   :  { %256 = vrot.lane.b32.xlu1 %v252_v40, %s340_s9 }
 0x20b   :  { %v271_v43 = vpop.permute.xlu1 %270 }
 0x20c   :  { %v275_v44 = vmul.f32 %v325_v24, %v271_v43 }
 0x20e   :  { %278 = vrot.lane.b32.xlu1 %v274_v42, %s341_s10 }
 0x212   :  { %280 = vrot.lane.b32.xlu1 %v275_v44, %s341_s10 }
 0x236   :  { %239 = vadd.xlane.f32.xlu1 %v238_v45 }
 0x239   :  { %v243_v54 = vpop.xlane.xlu0 %242 }
 0x278   :  { %v259_v46 = vpop.permute.xlu1 %258 }
 0x279   :  { %v265_v47 = vsel %vm136_vm3, %v259_v46, 0.0 }
 0x27a   :  { %266 = vadd.xlane.f32.xlu1 %v265_v47 }
 0x27c   :  { %v257_v48 = vpop.permute.xlu1 %256 }
 0x27d   :  { %v262_v49 = vsel %vm136_vm3, %v257_v48, 0.0 }
 0x27e   :  { %263 = vadd.xlane.f32.xlu0 %v262_v49 }
 0x280   :  { %v279_v50 = vpop.permute.xlu1 %278 }
 0x281   :  { %v284_v51 = vsel %vm136_vm3, %v279_v50, 0.0 }
 0x282   :  { %285 = vadd.xlane.f32.xlu0 %v284_v51 }
 0x284   :  { %v281_v52 = vpop.permute.xlu1 %280 }
 0x285   :  { %v287_v53 = vsel %vm136_vm3, %v281_v52, 0.0 }
 0x286   :  { %288 = vadd.xlane.f32.xlu1 %v287_v53 }
 0x2c3   :  { %v240_v55 = vpop.xlane.xlu1 %239 }
 0x307   :  { %v267_v57 = vpop.xlane.xlu1 %266 }
 0x308   :  { %v292_v61 = vsel %vm290_vm5, %v243_v54, %v267_v57 }
 0x30b   :  { %v264_v56 = vpop.xlane.xlu0 %263 }
 0x30c   :  { %v291_v58 = vsel %vm290_vm5, %v240_v55, %v264_v56 }
 0x30f   :  { %v286_v59 = vpop.xlane.xlu0 %285 }
 0x310   :  { %v294_v60 = vsel %vm293_vm4, %v291_v58, %v286_v59 }
 0x311   :  { %297 = vst.msk [vmem:[%s423_s6] sm:$0xff] %vm296_vm6, %v294_v60 }
 0x313   :  { %v289_v62 = vpop.xlane.xlu1 %288 }
 0x314   :  { %v295_v63 = vsel %vm293_vm4, %v292_v61, %v289_v62 }
 0x315   :  { %298 = vst.msk [vmem:[%s423_s6 + $0x8] sm:$0xff] %vm296_vm6, %v295_v63 }

</bundles_post_ra>
